<compile_context>
chip_gen: v7x
topology: tpu7x:2x2x1
jax: 0.10.0
libtpu: 0.0.40
codegen_flags: <defaults>
</compile_context>

<pallas_src>
import functools
import math

import jax
import jax.numpy as jnp
from jax.experimental import pallas as pl
from jax.experimental.pallas import tpu as pltpu

_LANE = 128
_SUBLANE = 8


def _round_up(x, m):
    return -(-x // m) * m


def rbcm_kernel(m_ref, v_ref, out_ref, *, log_prior_v, inv_prior_v, k_experts):
    m = m_ref[...].astype(jnp.float32)               # [K, TS, 128]
    v = v_ref[...].astype(jnp.float32)               # [K, TS, 128]

    inv_v = 1.0 / v                                  # reused for both sums
    log_v = jnp.log(v)
    log_v = jnp.where(jnp.isnan(log_v), 0.001, log_v)

    # Sums over the leading (expert) axis: K-1 full-vreg VPU adds, no XLU.
    sum_log_v = jnp.sum(log_v, axis=0)               # [TS, 128]
    gp_m_num = jnp.sum(m * inv_v, axis=0)            # [TS, 128]
    gp_v_den = jnp.sum(inv_v, axis=0)                # [TS, 128]

    # correction = sum_k 0.5*(log_prior_v - log v_k)
    #            = 0.5*(K*log_prior_v - sum_k log v_k)   (log_prior_v constant)
    correction = 0.5 * (k_experts * log_prior_v - sum_log_v)
    correction = (1.0 - correction) * inv_prior_v
    gp_v = 1.0 / (gp_v_den + correction)             # exact divide (keep accuracy)
    gp_m = gp_v * gp_m_num

    out_ref[0] = gp_m
    out_ref[1] = gp_v


def rbcm_predictive_layer(gps_m, gps_v, x_new, *, variance=1.0, lengthscale=1.0):
    """Pallas implementation of RobustBayesianCM.predictive_layer.

    gps_m, gps_v : [K, N, 1]  (stacked expert predictions, torch list-of-[N,1])
    x_new        : [N, D]     (only its length N matters: diag(K_rbf) = variance)
    returns (gp_m, gp_v), each [N, 1].
    """
    del lengthscale  # The RBF diagonal is independent of the lengthscale.
    K, N, _ = gps_m.shape
    assert x_new.shape[0] == N

    m = gps_m[..., 0]                                # [K, N] (free squeeze)
    v = gps_v[..., 0]                                # [K, N]

    # Keep native low-precision floats on the wire; upcast inside the kernel.
    ok_dtypes = (jnp.dtype(jnp.float32), jnp.dtype(jnp.bfloat16), jnp.dtype(jnp.float16))
    if m.dtype not in ok_dtypes:
        m = m.astype(jnp.float32)
    if v.dtype not in ok_dtypes:
        v = v.astype(jnp.float32)

    # prior_v = diag(variance * exp(-0.5*||x-x||^2/ls^2)) == variance, exactly.
    var = float(variance)
    if var > 0.0:
        log_prior_v = math.log(var)
    elif var == 0.0:
        log_prior_v = float("-inf")                  # torch.log(0) -> -inf (kept)
    else:
        log_prior_v = 0.001                          # torch: NaN -> 0.001
    inv_prior_v = (1.0 / var) if var != 0.0 else float("inf")

    # --- pad N only to the 128-lane boundary (needed for the free 3D reshape) ---
    n_pad128 = _round_up(N, _LANE)
    if n_pad128 != N:
        pad = n_pad128 - N
        m = jnp.pad(m, ((0, 0), (0, pad)))
        v = jnp.pad(v, ((0, 0), (0, pad)), constant_values=1.0)
    NB = n_pad128 // _LANE

    # Free (layout-preserving) reshape: [K, N] -> [K, NB, 128].
    m3 = m.reshape(K, NB, _LANE)
    v3 = v.reshape(K, NB, _LANE)

    # --- tile the NB (sublane-block) axis ---
    # Double-buffered VMEM bytes per unit of TS: 2 bufs * (2 inputs + 1 output).
    in_itemsize = jnp.dtype(m3.dtype).itemsize
    per_ts = 2 * _LANE * (2 * K * in_itemsize + 2 * 4)
    vmem_budget = 24 * 1024 * 1024
    ts_cap = max(_SUBLANE, (vmem_budget // per_ts) // _SUBLANE * _SUBLANE)

    if NB <= _SUBLANE:
        TS = NB                                      # full dim: single tiny step
    else:
        # >=2 grid steps so "parallel" can shard across v7x's 2 TensorCores,
        # but never exceed the VMEM-budgeted cap.
        half = _round_up(pl.cdiv(NB, 2), _SUBLANE)
        TS = min(ts_cap, half)
    grid = (pl.cdiv(NB, TS),)                        # ragged last block is masked

    kern = functools.partial(
        rbcm_kernel,
        log_prior_v=log_prior_v,
        inv_prior_v=inv_prior_v,
        k_experts=float(K),
    )

    cost = pl.CostEstimate(
        flops=int((6 * K + 8) * n_pad128),
        transcendentals=int(K * n_pad128),           # the per-expert logs
        bytes_accessed=int((2 * K * in_itemsize + 2 * 4) * n_pad128),
    )

    out = pl.pallas_call(
        kern,
        grid=grid,
        in_specs=[
            pl.BlockSpec((K, TS, _LANE), lambda i: (0, i, 0)),
            pl.BlockSpec((K, TS, _LANE), lambda i: (0, i, 0)),
        ],
        out_specs=pl.BlockSpec((2, TS, _LANE), lambda i: (0, i, 0)),
        out_shape=jax.ShapeDtypeStruct((2, NB, _LANE), jnp.float32),
        compiler_params=pltpu.CompilerParams(
            dimension_semantics=("parallel",),
            vmem_limit_bytes=48 * 1024 * 1024,
        ),
        cost_estimate=cost,
    )(m3, v3)

    out2 = out.reshape(2, n_pad128)
    gp_m = out2[0, :N][:, None]                      # [N, 1]
    gp_v = out2[1, :N][:, None]                      # [N, 1]
    return gp_m, gp_v


def rbcm_forward():
    # The torch module's forward() simply returns 1.0 (no tensor compute).
    return jnp.float32(1.0)


def _reference_predictive_layer(gps_m, gps_v, x_new, variance=1.0, lengthscale=1.0):
    # Pure-JAX port of the torch code, for correctness checking.
    K, N, _ = gps_m.shape
    diff = x_new[:, None, :] - x_new[None, :, :]
    gram = variance * jnp.exp(-0.5 * jnp.sum(diff * diff, -1) / lengthscale**2)
    prior_v = jnp.diagonal(gram)[:, None]
    log_prior_v = jnp.log(prior_v)
    log_prior_v = jnp.where(jnp.isnan(log_prior_v), 0.001, log_prior_v)
    gp_m = jnp.zeros((N, 1), jnp.float32)
    gp_v = jnp.zeros((N, 1), jnp.float32)
    corr = jnp.zeros((N, 1), jnp.float32)
    for k in range(K):
        m_k, v_k = gps_m[k], gps_v[k]
        log_v_k = jnp.log(v_k)
        log_v_k = jnp.where(jnp.isnan(log_v_k), 0.001, log_v_k)
        corr = corr + 0.5 * (log_prior_v - log_v_k)
        gp_m = gp_m + m_k / v_k
        gp_v = gp_v + 1.0 / v_k
    corr = (1.0 - corr) / prior_v
    gp_v = 1.0 / (gp_v + corr)
    gp_m = gp_v * gp_m
    return gp_m, gp_v


def _run_case(key, K, N, D):
    k1, k2, k3 = jax.random.split(key, 3)
    x_new = jax.random.normal(k1, (N, D), jnp.float32)
    gps_m = jax.random.normal(k2, (K, N, 1), jnp.float32)
    gps_v = jnp.exp(0.3 * jax.random.normal(k3, (K, N, 1), jnp.float32)) + 0.05

    gp_m, gp_v = rbcm_predictive_layer(gps_m, gps_v, x_new)
    jax.block_until_ready((gp_m, gp_v))

    ref_m, ref_v = _reference_predictive_layer(gps_m, gps_v, x_new)
    assert gp_m.shape == (N, 1) and gp_v.shape == (N, 1)
    assert jnp.allclose(gp_m, ref_m, rtol=1e-5, atol=1e-5)
    assert jnp.allclose(gp_v, ref_v, rtol=1e-5, atol=1e-5)


if __name__ == "__main__":
    key = jax.random.PRNGKey(0)
    k_a, k_b, k_c = jax.random.split(key, 3)

    # Primary small case (K experts, N query points), N a multiple of 128.
    _run_case(k_a, K=4, N=256, D=1)
    # Exercise the pad-to-128-lane path (N not a multiple of 128).
    _run_case(k_b, K=4, N=300, D=1)
    # Exercise the multi-step grid + ragged-final-block masking path.
    _run_case(k_c, K=4, N=1312, D=1)

    _ = jax.block_until_ready(rbcm_forward())        # module forward() -> 1.0
    print("KERNEL_OK")
</pallas_src>

<mosaic_0001>
module attributes {stable_mosaic.version = 11 : i64} {
  func.func @rbcm_kernel(%arg0: i32, %arg1: memref<4x2x128xf32, #tpu.memory_space<vmem>>, %arg2: memref<4x2x128xf32, #tpu.memory_space<vmem>>, %arg3: memref<2x2x128xf32, #tpu.memory_space<vmem>>) attributes {dimension_semantics = [#tpu.dimension_semantics<parallel>], iteration_bounds = array<i64: 1>, scalar_prefetch = 0 : i64, scratch_operands = 0 : i64, tpu.core_type = #tpu.core_type<tc>, window_params = [{transform_indices = @transform_0, window_bounds = array<i64: 4, 2, 128>}, {transform_indices = @transform_1, window_bounds = array<i64: 4, 2, 128>}, {transform_indices = @transform_2, window_bounds = array<i64: 2, 2, 128>}]} {
    %c0 = arith.constant 0 : index
    %c0_0 = arith.constant 0 : index
    %c0_1 = arith.constant 0 : index
    %0 = vector.load %arg1[%c0, %c0_0, %c0_1] : memref<4x2x128xf32, #tpu.memory_space<vmem>>, vector<4x2x128xf32>
    %c0_2 = arith.constant 0 : index
    %c0_3 = arith.constant 0 : index
    %c0_4 = arith.constant 0 : index
    %1 = vector.load %arg2[%c0_2, %c0_3, %c0_4] : memref<4x2x128xf32, #tpu.memory_space<vmem>>, vector<4x2x128xf32>
    %cst = arith.constant 1.000000e+00 : f32
    %2 = vector.broadcast %cst : f32 to vector<4x2x128xf32>
    %3 = arith.divf %2, %1 : vector<4x2x128xf32>
    %4 = math.log %1 : vector<4x2x128xf32>
    %5 = arith.cmpf one, %4, %4 : vector<4x2x128xf32>
    %cst_5 = arith.constant 1.000000e-03 : f32
    %6 = vector.broadcast %cst_5 : f32 to vector<4x2x128xf32>
    %7 = arith.select %5, %6, %4 : vector<4x2x128xi1>, vector<4x2x128xf32>
    %cst_6 = arith.constant dense<0.000000e+00> : vector<2x128xf32>
    %8 = vector.multi_reduction <add>, %7, %cst_6 [0] : vector<4x2x128xf32> to vector<2x128xf32>
    %9 = arith.mulf %0, %3 : vector<4x2x128xf32>
    %cst_7 = arith.constant dense<0.000000e+00> : vector<2x128xf32>
    %10 = vector.multi_reduction <add>, %9, %cst_7 [0] : vector<4x2x128xf32> to vector<2x128xf32>
    %cst_8 = arith.constant dense<0.000000e+00> : vector<2x128xf32>
    %11 = vector.multi_reduction <add>, %3, %cst_8 [0] : vector<4x2x128xf32> to vector<2x128xf32>
    %cst_9 = arith.constant 0.000000e+00 : f32
    %12 = vector.broadcast %cst_9 : f32 to vector<2x128xf32>
    %13 = arith.subf %12, %8 : vector<2x128xf32>
    %cst_10 = arith.constant 5.000000e-01 : f32
    %14 = vector.broadcast %cst_10 : f32 to vector<2x128xf32>
    %15 = arith.mulf %14, %13 : vector<2x128xf32>
    %cst_11 = arith.constant 1.000000e+00 : f32
    %16 = vector.broadcast %cst_11 : f32 to vector<2x128xf32>
    %17 = arith.subf %16, %15 : vector<2x128xf32>
    %cst_12 = arith.constant 1.000000e+00 : f32
    %18 = vector.broadcast %cst_12 : f32 to vector<2x128xf32>
    %19 = arith.mulf %17, %18 : vector<2x128xf32>
    %20 = arith.addf %11, %19 : vector<2x128xf32>
    %cst_13 = arith.constant 1.000000e+00 : f32
    %21 = vector.broadcast %cst_13 : f32 to vector<2x128xf32>
    %22 = arith.divf %21, %20 : vector<2x128xf32>
    %23 = arith.mulf %22, %10 : vector<2x128xf32>
    %c0_14 = arith.constant 0 : index
    %c0_15 = arith.constant 0 : index
    %c0_16 = arith.constant 0 : index
    %24 = vector.load %arg3[%c0_14, %c0_15, %c0_16] : memref<2x2x128xf32, #tpu.memory_space<vmem>>, vector<1x2x128xf32>
    %25 = vector.shape_cast %24 : vector<1x2x128xf32> to vector<2x128xf32>
    %26 = vector.shape_cast %23 : vector<2x128xf32> to vector<1x2x128xf32>
    tpu.vector_store %arg3[%c0_14, %c0_15, %c0_16], %26 {strides = array<i32>} : memref<2x2x128xf32, #tpu.memory_space<vmem>>, vector<1x2x128xf32>,
    %c1 = arith.constant 1 : index
    %c0_17 = arith.constant 0 : index
    %c0_18 = arith.constant 0 : index
    %27 = vector.load %arg3[%c1, %c0_17, %c0_18] : memref<2x2x128xf32, #tpu.memory_space<vmem>>, vector<1x2x128xf32>
    %28 = vector.shape_cast %27 : vector<1x2x128xf32> to vector<2x128xf32>
    %29 = vector.shape_cast %22 : vector<2x128xf32> to vector<1x2x128xf32>
    tpu.vector_store %arg3[%c1, %c0_17, %c0_18], %29 {strides = array<i32>} : memref<2x2x128xf32, #tpu.memory_space<vmem>>, vector<1x2x128xf32>,
    return
  }
  func.func @transform_0(%arg0: i32) -> (i32, i32, i32) {
    %c0_i32 = arith.constant 0 : i32
    %c0_i32_0 = arith.constant 0 : i32
    %c0_i32_1 = arith.constant 0 : i32
    return %c0_i32, %arg0, %c0_i32_0 : i32, i32, i32
  }
  func.func @transform_1(%arg0: i32) -> (i32, i32, i32) {
    %c0_i32 = arith.constant 0 : i32
    %c0_i32_0 = arith.constant 0 : i32
    %c0_i32_1 = arith.constant 0 : i32
    return %c0_i32, %arg0, %c0_i32_0 : i32, i32, i32
  }
  func.func @transform_2(%arg0: i32) -> (i32, i32, i32) {
    %c0_i32 = arith.constant 0 : i32
    %c0_i32_0 = arith.constant 0 : i32
    %c0_i32_1 = arith.constant 0 : i32
    return %c0_i32, %arg0, %c0_i32_0 : i32, i32, i32
  }
}

</mosaic_0001>

<bundles_post_ra>
// kernel: tpu_custom_call.1
= control target key start
LH: loop header
LB: loop body
LE: loop exit
PB: predicated region body
PF: predicated region fallthrough
CT: control target
= control target key end

     0   :  { %7 = vsyncpa [#allocation3], 0  ;;  %s298_s0 = inlined_call_operand.hbm [shape: f32[4,2,128], index: 0, kind: input, shape index: {}]   ;;  %s299_s1 = inlined_call_operand.hbm [shape: f32[4,2,128], index: 1, kind: input, shape index: {}]   ;;  %s300_s2 = inlined_call_operand.hbm [shape: f32[2,2,128], index: 2, kind: output, shape index: {}]  }
   0x1   :  { %8 = vsyncpa [#allocation6], 0 }
   0x2   :  { %9 = vsyncpa [#allocation4], 0  ;;  %s221_s9 = smov [#allocation2]   ;;  %s149_s13 = scalar_lea.hbm %s298_s0, 128 }
   0x3   :  { %s15_s10 = sshll.u32 %s221_s9, 4  ;;  %p150_p0 = scmp.ne.s32.totalorder %s298_s0, %s149_s13  ;;  %s16_s10 = int_to_ptr.vmem [resolvable:$true] %s15_s10 }
   0x4   :  { %p153_p1 = scmp.lt.u32.totalorder %s149_s13, %s298_s0 }
   0x6   :  { %p155_p2 = pnand %p153_p1, %p150_p0 }
   0x8   :  { %158 = shalt.err (!%p155_p2)
}
   0x9   :  { %s159_s18 = scalar_lea.vmem %s16_s10, 128  ;;  %p164_p4 = scmp.lt.s32.totalorder %s16_s10, %s16_s10 }
   0xa   :  { %p160_p3 = scmp.ne.s32.totalorder %s16_s10, %s159_s18  ;;  %p165_p5 = scmp.lt.s32.totalorder %s159_s18, %s159_s18 }
   0xc   :  { %p166_p6 = por %p165_p5, %p164_p4 }
   0xe   :  { %p167_p7 = pnand %p166_p6, %p160_p3 }
  0x10   :  { %170 = shalt.err (!%p167_p7)
}
  0x11   :  { %s222_s19 = smov 32   ;;  %s223_s20 = smov 2  }
  0x12   :  { %21 = dma.hbm_to_vmem [thread:$0]  %s298_s0, 128, %s16_s10, [#allocation3], %s222_s19, %s222_s19, %s223_s20  }
  0x13   :  { %s224_s23 = smov [#allocation5]   ;;  %s171_s27 = scalar_lea.hbm %s299_s1, 128 }
  0x14   :  { %s27_s24 = sshll.u32 %s224_s23, 4  ;;  %p172_p8 = scmp.ne.s32.totalorder %s299_s1, %s171_s27  ;;  %s28_s24 = int_to_ptr.vmem [resolvable:$true] %s27_s24 }
  0x15   :  { %p175_p9 = scmp.lt.u32.totalorder %s171_s27, %s299_s1 }
  0x17   :  { %p177_p10 = pnand %p175_p9, %p172_p8 }
  0x19   :  { %180 = shalt.err (!%p177_p10)
}
  0x1a   :  { %s181_s4 = scalar_lea.vmem %s28_s24, 128  ;;  %p186_p12 = scmp.lt.s32.totalorder %s28_s24, %s28_s24 }
  0x1b   :  { %p182_p11 = scmp.ne.s32.totalorder %s28_s24, %s181_s4  ;;  %p187_p13 = scmp.lt.s32.totalorder %s181_s4, %s181_s4 }
  0x1d   :  { %p188_p0 = por %p187_p13, %p186_p12 }
  0x1f   :  { %p189_p1 = pnand %p188_p0, %p182_p11 }
  0x21   :  { %192 = shalt.err (!%p189_p1)
}
  0x22   :  { %33 = dma.hbm_to_vmem [thread:$0]  %s299_s1, 128, %s28_s24, [#allocation6], %s222_s19, %s222_s19, %s223_s20  }
  0x23   :  { %215 = dma.done.wait [#allocation3], 128  }
  0x24   :  { %216 = vsyncadd [#allocation3], 4294967168 }
  0x25   :  { %217 = dma.done.wait [#allocation6], 128  }
  0x26   :  { %218 = vsyncadd [#allocation6], 4294967168  ;;  %v44_v0 = vld [vmem:[#allocation5] sm:$0x3]  ;;  %v45_v1 = vld [vmem:[#allocation5 + $0x2] sm:$0x3] }
  0x27   :  { %131 = vrcp.f32 %v44_v0  ;;  %v46_v2 = vld [vmem:[#allocation5 + $0x4] sm:$0x3]  ;;  %v47_v3 = vld [vmem:[#allocation5 + $0x6] sm:$0x3]  ;;  %vm72_vm0 = vcmask 1041408   ;;  %s225_s1 = smov [#allocation7]  }
  0x28   :  { %133 = vrcp.f32 %v45_v1  ;;  %v40_v30 = vld [vmem:[#allocation2] sm:$0x3]  ;;  %v41_v31 = vld [vmem:[#allocation2 + $0x2] sm:$0x3]  ;;  %v42_v38 = vld [vmem:[#allocation2 + $0x4] sm:$0x3] }
  0x29   :  { %135 = vlog2.f32 %v44_v0  ;;  %v43_v45 = vld [vmem:[#allocation2 + $0x6] sm:$0x3]  ;;  %s113_s6 = sshll.u32 %s225_s1, 4  ;;  %s114_s6 = int_to_ptr.vmem [resolvable:$true] %s113_s6 }
  0x2a   :  { %137 = vlog2.f32 %v45_v1  ;;  %s193_s7 = scalar_lea.vmem %s114_s6, 64  ;;  %p198_p3 = scmp.lt.s32.totalorder %s114_s6, %s114_s6 }
  0x2b   :  { %139 = vlog2.f32 %v46_v2  ;;  %p194_p2 = scmp.ne.s32.totalorder %s114_s6, %s193_s7  ;;  %p199_p4 = scmp.lt.s32.totalorder %s193_s7, %s193_s7 }
  0x2c   :  { %141 = vlog2.f32 %v47_v3 }
  0x2d   :  { %143 = vrcp.f32 %v46_v2  ;;  %p200_p5 = por %p199_p4, %p198_p3 }
  0x2e   :  { %145 = vrcp.f32 %v47_v3 }
  0x2f   :  { %p201_p6 = pnand %p200_p5, %p194_p2 }
  0x31   :  { %v132_v4 = vpop.eup %131 }
  0x32   :  { %v134_v5 = vpop.eup %133  ;;  %v91_v13 = vsel %vm72_vm0, %v132_v4, 0.0  ;;  %v80_v35 = vmul.f32 %v132_v4, %v40_v30 }
  0x33   :  { %v136_v6 = vpop.eup %135  ;;  %v92_v16 = vsel %vm72_vm0, %v134_v5, 0.0  ;;  %v81_v36 = vmul.f32 %v134_v5, %v41_v31 }
  0x34   :  { %v138_v7 = vpop.eup %137  ;;  %v57_v8 = vmul.f32 0.6931472, %v136_v6  ;;  %v93_v25 = vadd.f32 %v92_v16, %v91_v13  ;;  %v84_v42 = vsel %vm72_vm0, %v80_v35, 0.0 }
  0x35   :  { %v140_v9 = vpop.eup %139  ;;  %v59_v10 = vmul.f32 0.6931472, %v138_v7  ;;  %v85_v43 = vsel %vm72_vm0, %v81_v36, 0.0 }
  0x36   :  { %v142_v11 = vpop.eup %141  ;;  %v61_v12 = vmul.f32 0.6931472, %v140_v9  ;;  %vm64_vm1 = vcmp.ne.f32.partialorder %v57_v8, %v57_v8  ;;  %v86_v47 = vadd.f32 %v85_v43, %v84_v42 }
  0x37   :  { %v63_v14 = vmul.f32 0.6931472, %v142_v11  ;;  %vm65_vm2 = vcmp.ne.f32.partialorder %v59_v10, %v59_v10  ;;  %v68_v15 = vsel %vm64_vm1, 0.001, %v57_v8  ;;  %v144_v17 = vpop.eup %143 }
  0x38   :  { %vm66_vm3 = vcmp.ne.f32.partialorder %v61_v12, %v61_v12  ;;  %v69_v18 = vsel %vm65_vm2, 0.001, %v59_v10  ;;  %v73_v19 = vsel %vm72_vm0, %v68_v15, 0.0  ;;  %v94_v27 = vsel %vm72_vm0, %v144_v17, 0.0  ;;  %v146_v28 = vpop.eup %145 }
  0x39   :  { %vm67_vm4 = vcmp.ne.f32.partialorder %v63_v14, %v63_v14  ;;  %v70_v20 = vsel %vm66_vm3, 0.001, %v61_v12  ;;  %v74_v21 = vsel %vm72_vm0, %v69_v18, 0.0  ;;  %v95_v33 = vadd.f32 %v94_v27, %v93_v25 }
  0x3a   :  { %v71_v22 = vsel %vm67_vm4, 0.001, %v63_v14  ;;  %v75_v23 = vadd.f32 %v74_v21, %v73_v19  ;;  %v76_v24 = vsel %vm72_vm0, %v70_v20, 0.0  ;;  %v96_v34 = vsel %vm72_vm0, %v146_v28, 0.0 }
  0x3b   :  { %v78_v26 = vsel %vm72_vm0, %v71_v22, 0.0  ;;  %v97_v39 = vadd.f32 %v96_v34, %v95_v33  ;;  %v82_v41 = vmul.f32 %v144_v17, %v42_v38  ;;  %v83_v48 = vmul.f32 %v146_v28, %v43_v45 }
  0x3c   :  { %v77_v29 = vadd.f32 %v76_v24, %v75_v23 }
  0x3d   :  { %v87_v49 = vsel %vm72_vm0, %v82_v41, 0.0  ;;  %v89_v51 = vsel %vm72_vm0, %v83_v48, 0.0 }
  0x3e   :  { %v79_v32 = vadd.f32 %v78_v26, %v77_v29  ;;  %v88_v50 = vadd.f32 %v87_v49, %v86_v47 }
  0x40   :  { %v98_v37 = vsub.f32 0.0, %v79_v32  ;;  %v90_v52 = vadd.f32 %v89_v51, %v88_v50 }
  0x42   :  { %v99_v40 = vmul.f32 0.5, %v98_v37 }
  0x44   :  { %v100_v44 = vsub.f32 1.0, %v99_v40 }
  0x46   :  { %v101_v46 = vadd.f32 %v100_v44, %v97_v39 }
  0x48   :  { %147 = vrcp.f32 %v101_v46 }
  0x52   :  { %v148_v53 = vpop.eup %147 }
  0x53   :  { %v104_v54 = vmul.f32 %v148_v53, %v90_v52  ;;  %107 = vst [vmem:[#allocation7 + $0x2] sm:$0x3] %v148_v53 }
  0x55   :  { %105 = vst [vmem:[#allocation7] sm:$0x3] %v104_v54 }
  0x56   :  { %204 = shalt.err (!%p201_p6)
}
  0x57   :  { %s205_s10 = scalar_lea.hbm %s300_s2, 64 }
  0x58   :  { %p206_p7 = scmp.ne.s32.totalorder %s300_s2, %s205_s10  ;;  %p209_p8 = scmp.lt.u32.totalorder %s205_s10, %s300_s2 }
  0x5a   :  { %p211_p9 = pnand %p209_p8, %p206_p7 }
  0x5c   :  { %214 = shalt.err (!%p211_p9)
}
  0x5d   :  { %119 = dma.vmem_to_hbm [thread:$0]  %s114_s6, 64, %s300_s2, [#allocation4], %s222_s19, %s222_s19, %s223_s20  }
  0x5e   :  { %219 = dma.done.wait [#allocation4], 64  }
  0x5f   :  { %220 = vsyncadd [#allocation4], 4294967232 }
  0x60   :  { %123 = vsyncpa [#allocation3], 1 }
  0x61   :  { %124 = vsyncpa [#allocation6], 1 }
  0x62   :  { %125 = vsyncpa [#allocation4], 1 }

</bundles_post_ra>
